<compile_context>
chip_gen: v5e
topology: v5e:2x2
jax: 0.10.0
libtpu: 0.0.40
codegen_flags: <defaults>
</compile_context>

<pallas_src>
import functools

import jax
import jax.numpy as jnp
from jax.experimental import pallas as pl
from jax.experimental.pallas import tpu as pltpu

INPUT_DIM = 1024
OUTPUT_DIM = 10
SUBLANE = 8                # batch tile must be a multiple of this
X_BUF_BYTES = 8 << 20      # target size of ONE x pipeline buffer (x2 double-buffered)


def _round_up(n, m):
    return ((n + m - 1) // m) * m


def _batch_axis_semantics():
    """v7x has 2 TensorCores per chip sharing HBM: split batch tiles across them."""
    try:
        kind = jax.devices()[0].device_kind.lower()
    except Exception:
        kind = ""
    if "v7" in kind:
        return (pltpu.CORE_PARALLEL,)
    return (pltpu.PARALLEL,)


def _logreg_kernel(x_ref, w_ref, b_ref, o_ref, *, mxu_dtype):
    # x_ref: (TB, 1024)  w_ref: (1024, 10)  b_ref: (1, 10)  o_ref: (TB, 10)
    x = x_ref[...]
    w = w_ref[...]
    if mxu_dtype is not None:
        # In-kernel cast (VPU) right before the MXU dot; no extra HBM pass.
        x = x.astype(mxu_dtype)
        w = w.astype(mxu_dtype)
    elif not jnp.issubdtype(x.dtype, jnp.floating):
        # Narrow integer inputs (e.g. uint8 MNIST pixels kept small in HBM):
        # upcast on the VPU so the MXU sees a float matmul.
        x = x.astype(jnp.float32)
        w = w.astype(jnp.float32)
    logits = jnp.dot(x, w, preferred_element_type=jnp.float32)      # (TB, 10)
    logits = logits + b_ref[...].astype(jnp.float32)                # bias broadcast
    m = jnp.max(logits, axis=-1, keepdims=True)                     # row max
    shifted = logits - m
    lse = jnp.log(jnp.sum(jnp.exp(shifted), axis=-1, keepdims=True))
    o_ref[...] = shifted - lse                                      # log_softmax


@functools.partial(jax.jit, static_argnames=("mxu_dtype",))
def mnist_logreg_forward(x, weight, bias, *, mxu_dtype=None):
    """x: any shape that flattens to (-1, 1024), any float/int dtype.
    weight: (10, 1024) torch layout.  bias: (10,).
    Returns (B, 10) float32 log-probabilities."""
    x2 = x.reshape(-1, INPUT_DIM)           # reshape only -- no cast, no pad
    B = x2.shape[0]
    itemsize = jnp.dtype(x2.dtype).itemsize

    # Batch tile: big enough to amortise the ~0.35 us per-grid-step overhead,
    # small enough that the double-buffered x tile stays ~16 MiB.
    tb_max = max(SUBLANE,
                 (X_BUF_BYTES // (INPUT_DIM * itemsize)) // SUBLANE * SUBLANE)
    TB = min(tb_max, _round_up(B, SUBLANE))
    nb = pl.cdiv(B, TB)                     # partial last block handled by Pallas

    w = weight.T                            # (1024, 10), ~40 KiB, VMEM-resident
    b = bias.reshape(1, OUTPUT_DIM)

    # Scoped VMEM: x double-buffer dominates; W / bias / out are negligible.
    vmem_needed = (2 * TB * INPUT_DIM * itemsize
                   + 2 * INPUT_DIM * OUTPUT_DIM * jnp.dtype(w.dtype).itemsize
                   + 2 * OUTPUT_DIM * jnp.dtype(b.dtype).itemsize
                   + 2 * TB * OUTPUT_DIM * 4)
    vmem_limit = int(min(max(2 * vmem_needed, 16 << 20), 48 << 20))

    cost = pl.CostEstimate(
        flops=2 * B * INPUT_DIM * OUTPUT_DIM,
        transcendentals=B * (OUTPUT_DIM + 1),
        bytes_accessed=(x2.size * itemsize
                        + w.size * jnp.dtype(w.dtype).itemsize
                        + b.size * jnp.dtype(b.dtype).itemsize
                        + B * OUTPUT_DIM * 4),
    )

    return pl.pallas_call(
        functools.partial(_logreg_kernel, mxu_dtype=mxu_dtype),
        out_shape=jax.ShapeDtypeStruct((B, OUTPUT_DIM), jnp.float32),
        grid=(nb,),
        in_specs=[
            pl.BlockSpec((TB, INPUT_DIM), lambda i: (i, 0)),          # x tile (streamed)
            pl.BlockSpec((INPUT_DIM, OUTPUT_DIM), lambda i: (0, 0)),  # W resident
            pl.BlockSpec((1, OUTPUT_DIM), lambda i: (0, 0)),          # bias resident
        ],
        out_specs=pl.BlockSpec((TB, OUTPUT_DIM), lambda i: (i, 0)),
        compiler_params=pltpu.CompilerParams(
            dimension_semantics=_batch_axis_semantics(),
            vmem_limit_bytes=vmem_limit),
        cost_estimate=cost,
    )(x2, w, b)


def _reference(x, weight, bias):
    x2 = x.reshape(-1, INPUT_DIM).astype(jnp.float32)
    logits = x2 @ weight.T.astype(jnp.float32) + bias.astype(jnp.float32)
    return jax.nn.log_softmax(logits, axis=1)


if __name__ == "__main__":
    key = jax.random.PRNGKey(0)
    kx, kw, kb = jax.random.split(key, 3)

    # Small MNIST-like input: batch=8, 1 channel, 32x32 (=1024 features).
    x = jax.random.normal(kx, (8, 1, 32, 32), dtype=jnp.float32)

    # Deterministic Linear(1024, 10) init (torch-style uniform +/- 1/sqrt(fan_in)).
    bound = 1.0 / (INPUT_DIM ** 0.5)
    weight = jax.random.uniform(kw, (OUTPUT_DIM, INPUT_DIM),
                                minval=-bound, maxval=bound, dtype=jnp.float32)
    bias = jax.random.uniform(kb, (OUTPUT_DIM,),
                              minval=-bound, maxval=bound, dtype=jnp.float32)

    ref = _reference(x, weight, bias)

    # 1) f32 path: exact semantics of the PyTorch module.
    out = jax.block_until_ready(mnist_logreg_forward(x, weight, bias))
    assert out.shape == (8, OUTPUT_DIM)
    assert jnp.allclose(out, ref, atol=1e-5, rtol=1e-5), "f32 mismatch vs reference"
    assert jnp.allclose(jnp.sum(jnp.exp(out), axis=1), 1.0, atol=1e-5)

    # 2) Non-multiple-of-8 batch exercises the partial-block (masked) path.
    x_odd = x[:5]
    out_odd = jax.block_until_ready(mnist_logreg_forward(x_odd, weight, bias))
    assert out_odd.shape == (5, OUTPUT_DIM)
    assert jnp.allclose(out_odd, _reference(x_odd, weight, bias),
                        atol=1e-5, rtol=1e-5), "partial-block mismatch"

    # 3) In-kernel bf16 MXU cast (no wrapper-side copy of x).
    out_bf = jax.block_until_ready(
        mnist_logreg_forward(x, weight, bias, mxu_dtype=jnp.bfloat16))
    assert out_bf.shape == (8, OUTPUT_DIM)
    assert jnp.allclose(out_bf, ref, atol=2e-2), "bf16 MXU mismatch vs reference"

    # 4) Narrow input kept narrow in HBM (bf16 here); kernel upcasts on the VPU.
    #    Real data pipelines should produce bf16/uint8 directly to halve/quarter
    #    the dominant x HBM read.
    x_bf16 = x.astype(jnp.bfloat16)   # test setup only
    out_narrow = jax.block_until_ready(mnist_logreg_forward(x_bf16, weight, bias))
    assert out_narrow.shape == (8, OUTPUT_DIM)
    assert jnp.allclose(out_narrow, ref, atol=2e-2), "narrow-input mismatch"

    print("KERNEL_OK")
</pallas_src>

<mosaic_0001>
module attributes {stable_mosaic.version = 11 : i64} {
  func.func @_logreg_kernel(%arg0: i32, %arg1: memref<8x1024xf32, #tpu.memory_space<vmem>>, %arg2: memref<1024x10xf32, #tpu.memory_space<vmem>>, %arg3: memref<1x10xf32, #tpu.memory_space<vmem>>, %arg4: memref<8x10xf32, #tpu.memory_space<vmem>>) attributes {dimension_semantics = [#tpu.dimension_semantics<parallel>], iteration_bounds = array<i64: 1>, scalar_prefetch = 0 : i64, scratch_operands = 0 : i64, tpu.core_type = #tpu.core_type<tc>, window_params = [{transform_indices = @transform_0, window_bounds = array<i64: 8, 1024>}, {pipeline_mode = #tpu.pipeline_mode<synchronous>, transform_indices = @transform_1, window_bounds = array<i64: 1024, 10>}, {pipeline_mode = #tpu.pipeline_mode<synchronous>, transform_indices = @transform_2, window_bounds = array<i64: 1, 10>}, {transform_indices = @transform_3, window_bounds = array<i64: 8, 10>}]} {
    %c0 = arith.constant 0 : index
    %c0_0 = arith.constant 0 : index
    %0 = vector.load %arg1[%c0, %c0_0] : memref<8x1024xf32, #tpu.memory_space<vmem>>, vector<8x1024xf32>
    %c0_1 = arith.constant 0 : index
    %c0_2 = arith.constant 0 : index
    %1 = vector.load %arg2[%c0_1, %c0_2] : memref<1024x10xf32, #tpu.memory_space<vmem>>, vector<1024x10xf32>
    %cst = arith.constant dense<0.000000e+00> : vector<8x10xf32>
    %2 = tpu.matmul %0, %1, %cst {dimension_numbers = #tpu.dot_dimension_numbers<[1], [0], [0], [1], [0, 0, 1, 1], [], []>} : vector<8x1024xf32>, vector<1024x10xf32>, vector<8x10xf32> -> vector<8x10xf32>
    %c0_3 = arith.constant 0 : index
    %c0_4 = arith.constant 0 : index
    %3 = vector.load %arg3[%c0_3, %c0_4] : memref<1x10xf32, #tpu.memory_space<vmem>>, vector<1x10xf32>
    %4 = vector.broadcast %3 : vector<1x10xf32> to vector<8x10xf32>
    %5 = arith.addf %2, %4 : vector<8x10xf32>
    %cst_5 = arith.constant dense<0xFF800000> : vector<8xf32>
    %6 = vector.multi_reduction <maximumf>, %5, %cst_5 [1] : vector<8x10xf32> to vector<8xf32>
    %7 = vector.shape_cast %6 : vector<8xf32> to vector<8x1xf32>
    %8 = vector.broadcast %7 : vector<8x1xf32> to vector<8x10xf32>
    %9 = arith.subf %5, %8 : vector<8x10xf32>
    %10 = math.exp %9 : vector<8x10xf32>
    %cst_6 = arith.constant dense<0.000000e+00> : vector<8xf32>
    %11 = vector.multi_reduction <add>, %10, %cst_6 [1] : vector<8x10xf32> to vector<8xf32>
    %12 = vector.shape_cast %11 : vector<8xf32> to vector<8x1xf32>
    %13 = math.log %12 : vector<8x1xf32>
    %14 = vector.broadcast %13 : vector<8x1xf32> to vector<8x10xf32>
    %15 = arith.subf %9, %14 : vector<8x10xf32>
    %c0_7 = arith.constant 0 : index
    %c0_8 = arith.constant 0 : index
    %16 = vector.load %arg4[%c0_7, %c0_8] : memref<8x10xf32, #tpu.memory_space<vmem>>, vector<8x10xf32>
    tpu.vector_store %arg4[%c0_7, %c0_8], %15 {strides = array<i32>} : memref<8x10xf32, #tpu.memory_space<vmem>>, vector<8x10xf32>,
    return
  }
  func.func @transform_0(%arg0: i32) -> (i32, i32) {
    %c0_i32 = arith.constant 0 : i32
    %c0_i32_0 = arith.constant 0 : i32
    return %arg0, %c0_i32 : i32, i32
  }
  func.func @transform_1(%arg0: i32) -> (i32, i32) {
    %c0_i32 = arith.constant 0 : i32
    %c0_i32_0 = arith.constant 0 : i32
    %c0_i32_1 = arith.constant 0 : i32
    return %c0_i32, %c0_i32_0 : i32, i32
  }
  func.func @transform_2(%arg0: i32) -> (i32, i32) {
    %c0_i32 = arith.constant 0 : i32
    %c0_i32_0 = arith.constant 0 : i32
    %c0_i32_1 = arith.constant 0 : i32
    return %c0_i32, %c0_i32_0 : i32, i32
  }
  func.func @transform_3(%arg0: i32) -> (i32, i32) {
    %c0_i32 = arith.constant 0 : i32
    %c0_i32_0 = arith.constant 0 : i32
    return %arg0, %c0_i32 : i32, i32
  }
}

</mosaic_0001>

<bundles_post_ra>
// kernel: mnist_logreg_forward.1
= control target key start
LH: loop header
LB: loop body
LE: loop exit
PB: predicated region body
PF: predicated region fallthrough
CT: control target
= control target key end

     0   :  { %s815_s0 = inlined_call_operand.vmem [shape: f32[8,1024], index: 0, kind: input, shape index: {}]   ;;  %s816_s1 = inlined_call_operand.vmem [shape: f32[1024,10], index: 1, kind: input, shape index: {}]   ;;  %s817_s2 = inlined_call_operand.vmem [shape: f32[1,10], index: 2, kind: input, shape index: {}]   ;;  %s818_s3 = inlined_call_operand.hbm [shape: f32[8,10], index: 3, kind: output, shape index: {}]  }
   0x1   :  { %v70_v0 = vld [vmem:[%s816_s1 + $0x178] sm:$0xff]  ;;  %v69_v2 = vld [vmem:[%s816_s1 + $0x170] sm:$0xff]  ;;  %v68_v6 = vld [vmem:[%s816_s1 + $0x168] sm:$0xff] }
   0x2   :  { %v38_v1 = vld [vmem:[%s816_s1 + $0x78] sm:$0xff]  ;;  %195 = vmatpush.msra.mxu2 %v70_v0  ;;  %v37_v4 = vld [vmem:[%s816_s1 + $0x70] sm:$0xff]  ;;  %v36_v8 = vld [vmem:[%s816_s1 + $0x68] sm:$0xff] }
   0x3   :  { %155 = vmatpush.msra.mxu0 %v38_v1  ;;  %v86_v3 = vld [vmem:[%s816_s1 + $0x1f8] sm:$0xff]  ;;  %v85_v7 = vld [vmem:[%s816_s1 + $0x1f0] sm:$0xff]  ;;  %v84_v10 = vld [vmem:[%s816_s1 + $0x1e8] sm:$0xff] }
   0x4   :  { %v54_v5 = vld [vmem:[%s816_s1 + $0xf8] sm:$0xff]  ;;  %215 = vmatpush.msra.mxu3 %v86_v3  ;;  %196 = vmatpush.msra.mxu2 %v69_v2  ;;  %v53_v9 = vld [vmem:[%s816_s1 + $0xf0] sm:$0xff]  ;;  %v67_v11 = vld [vmem:[%s816_s1 + $0x160] sm:$0xff] }
   0x5   :  { %175 = vmatpush.msra.mxu1 %v54_v5  ;;  %156 = vmatpush.msra.mxu0 %v37_v4  ;;  %v35_v12 = vld [vmem:[%s816_s1 + $0x60] sm:$0xff]  ;;  %v52_v13 = vld [vmem:[%s816_s1 + $0xe8] sm:$0xff]  ;;  %v66_v16 = vld [vmem:[%s816_s1 + $0x158] sm:$0xff] }
   0x6   :  { %216 = vmatpush.msra.mxu3 %v85_v7  ;;  %197 = vmatpush.msra.mxu2 %v68_v6  ;;  %v83_v14 = vld [vmem:[%s816_s1 + $0x1e0] sm:$0xff]  ;;  %v34_v17 = vld [vmem:[%s816_s1 + $0x58] sm:$0xff]  ;;  %v65_v20 = vld [vmem:[%s816_s1 + $0x150] sm:$0xff] }
   0x7   :  { %176 = vmatpush.msra.mxu1 %v53_v9  ;;  %157 = vmatpush.msra.mxu0 %v36_v8  ;;  %v51_v15 = vld [vmem:[%s816_s1 + $0xe0] sm:$0xff]  ;;  %v82_v18 = vld [vmem:[%s816_s1 + $0x1d8] sm:$0xff]  ;;  %v33_v21 = vld [vmem:[%s816_s1 + $0x50] sm:$0xff] }
   0x8   :  { %217 = vmatpush.msra.mxu3 %v84_v10  ;;  %198 = vmatpush.msra.mxu2 %v67_v11  ;;  %v50_v19 = vld [vmem:[%s816_s1 + $0xd8] sm:$0xff]  ;;  %v81_v22 = vld [vmem:[%s816_s1 + $0x1d0] sm:$0xff]  ;;  %v64_v24 = vld [vmem:[%s816_s1 + $0x148] sm:$0xff] }
   0x9   :  { %177 = vmatpush.msra.mxu1 %v52_v13  ;;  %158 = vmatpush.msra.mxu0 %v35_v12  ;;  %v49_v23 = vld [vmem:[%s816_s1 + $0xd0] sm:$0xff]  ;;  %v32_v25 = vld [vmem:[%s816_s1 + $0x48] sm:$0xff]  ;;  %v63_v28 = vld [vmem:[%s816_s1 + $0x140] sm:$0xff] }
   0xa   :  { %218 = vmatpush.msra.mxu3 %v83_v14  ;;  %199 = vmatpush.msra.mxu2 %v66_v16  ;;  %v80_v26 = vld [vmem:[%s816_s1 + $0x1c8] sm:$0xff]  ;;  %v31_v29 = vld [vmem:[%s816_s1 + $0x40] sm:$0xff]  ;;  %v62_v32 = vld [vmem:[%s816_s1 + $0x138] sm:$0xff] }
   0xb   :  { %178 = vmatpush.msra.mxu1 %v51_v15  ;;  %159 = vmatpush.msra.mxu0 %v34_v17  ;;  %v48_v27 = vld [vmem:[%s816_s1 + $0xc8] sm:$0xff]  ;;  %v79_v30 = vld [vmem:[%s816_s1 + $0x1c0] sm:$0xff]  ;;  %v30_v33 = vld [vmem:[%s816_s1 + $0x38] sm:$0xff] }
   0xc   :  { %219 = vmatpush.msra.mxu3 %v82_v18  ;;  %200 = vmatpush.msra.mxu2 %v65_v20  ;;  %v47_v31 = vld [vmem:[%s816_s1 + $0xc0] sm:$0xff]  ;;  %v78_v34 = vld [vmem:[%s816_s1 + $0x1b8] sm:$0xff]  ;;  %v61_v36 = vld [vmem:[%s816_s1 + $0x130] sm:$0xff] }
   0xd   :  { %179 = vmatpush.msra.mxu1 %v50_v19  ;;  %160 = vmatpush.msra.mxu0 %v33_v21  ;;  %v46_v35 = vld [vmem:[%s816_s1 + $0xb8] sm:$0xff]  ;;  %v29_v37 = vld [vmem:[%s816_s1 + $0x30] sm:$0xff]  ;;  %v60_v40 = vld [vmem:[%s816_s1 + $0x128] sm:$0xff] }
   0xe   :  { %220 = vmatpush.msra.mxu3 %v81_v22  ;;  %201 = vmatpush.msra.mxu2 %v64_v24  ;;  %v77_v38 = vld [vmem:[%s816_s1 + $0x1b0] sm:$0xff]  ;;  %v28_v41 = vld [vmem:[%s816_s1 + $0x28] sm:$0xff]  ;;  %v59_v44 = vld [vmem:[%s816_s1 + $0x120] sm:$0xff] }
   0xf   :  { %180 = vmatpush.msra.mxu1 %v49_v23  ;;  %161 = vmatpush.msra.mxu0 %v32_v25  ;;  %v45_v39 = vld [vmem:[%s816_s1 + $0xb0] sm:$0xff]  ;;  %v76_v42 = vld [vmem:[%s816_s1 + $0x1a8] sm:$0xff]  ;;  %v27_v45 = vld [vmem:[%s816_s1 + $0x20] sm:$0xff] }
  0x10   :  { %221 = vmatpush.msra.mxu3 %v80_v26  ;;  %202 = vmatpush.msra.mxu2 %v63_v28  ;;  %v44_v43 = vld [vmem:[%s816_s1 + $0xa8] sm:$0xff]  ;;  %v75_v46 = vld [vmem:[%s816_s1 + $0x1a0] sm:$0xff]  ;;  %v58_v48 = vld [vmem:[%s816_s1 + $0x118] sm:$0xff] }
  0x11   :  { %181 = vmatpush.msra.mxu1 %v48_v27  ;;  %162 = vmatpush.msra.mxu0 %v31_v29  ;;  %v43_v47 = vld [vmem:[%s816_s1 + $0xa0] sm:$0xff]  ;;  %v26_v49 = vld [vmem:[%s816_s1 + $0x18] sm:$0xff]  ;;  %v57_v52 = vld [vmem:[%s816_s1 + $0x110] sm:$0xff] }
  0x12   :  { %222 = vmatpush.msra.mxu3 %v79_v30  ;;  %203 = vmatpush.msra.mxu2 %v62_v32  ;;  %v74_v50 = vld [vmem:[%s816_s1 + $0x198] sm:$0xff]  ;;  %v25_v53 = vld [vmem:[%s816_s1 + $0x10] sm:$0xff]  ;;  %v56_v56 = vld [vmem:[%s816_s1 + $0x108] sm:$0xff] }
  0x13   :  { %182 = vmatpush.msra.mxu1 %v47_v31  ;;  %163 = vmatpush.msra.mxu0 %v30_v33  ;;  %v42_v51 = vld [vmem:[%s816_s1 + $0x98] sm:$0xff]  ;;  %v73_v54 = vld [vmem:[%s816_s1 + $0x190] sm:$0xff]  ;;  %v24_v57 = vld [vmem:[%s816_s1 + $0x8] sm:$0xff] }
  0x14   :  { %223 = vmatpush.msra.mxu3 %v78_v34  ;;  %204 = vmatpush.msra.mxu2 %v61_v36  ;;  %v41_v55 = vld [vmem:[%s816_s1 + $0x90] sm:$0xff]  ;;  %v72_v58 = vld [vmem:[%s816_s1 + $0x188] sm:$0xff]  ;;  %v55_v60 = vld [vmem:[%s816_s1 + $0x100] sm:$0xff] }
  0x15   :  { %183 = vmatpush.msra.mxu1 %v46_v35  ;;  %164 = vmatpush.msra.mxu0 %v29_v37  ;;  %v40_v59 = vld [vmem:[%s816_s1 + $0x88] sm:$0xff]  ;;  %v23_v61 = vld [vmem:[%s816_s1] sm:$0xff]  ;;  %v134_v62 = vld [vmem:[%s816_s1 + $0x378] sm:$0xff] }
  0x16   :  { %224 = vmatpush.msra.mxu3 %v77_v38  ;;  %205 = vmatpush.msra.mxu2 %v60_v40  ;;  %v71_v63 = vld [vmem:[%s816_s1 + $0x180] sm:$0xff]  ;;  %v102_v0 = vld [vmem:[%s816_s1 + $0x278] sm:$0xff]  ;;  %v133_v2 = vld [vmem:[%s816_s1 + $0x370] sm:$0xff] }
  0x17   :  { %184 = vmatpush.msra.mxu1 %v45_v39  ;;  %165 = vmatpush.msra.mxu0 %v28_v41  ;;  %v150_v1 = vld [vmem:[%s816_s1 + $0x3f8] sm:$0xff]  ;;  %v39_v3 = vld [vmem:[%s816_s1 + $0x80] sm:$0xff]  ;;  %v101_v4 = vld [vmem:[%s816_s1 + $0x270] sm:$0xff] }
  0x18   :  { %225 = vmatpush.msra.mxu3 %v76_v42  ;;  %206 = vmatpush.msra.mxu2 %v59_v44  ;;  %v118_v5 = vld [vmem:[%s816_s1 + $0x2f8] sm:$0xff]  ;;  %v132_v6 = vld [vmem:[%s816_s1 + $0x368] sm:$0xff]  ;;  %v149_v7 = vld [vmem:[%s816_s1 + $0x3f0] sm:$0xff] }
  0x19   :  { %185 = vmatpush.msra.mxu1 %v44_v43  ;;  %166 = vmatpush.msra.mxu0 %v27_v45  ;;  %v100_v8 = vld [vmem:[%s816_s1 + $0x268] sm:$0xff]  ;;  %v117_v9 = vld [vmem:[%s816_s1 + $0x2f0] sm:$0xff]  ;;  %v131_v10 = vld [vmem:[%s816_s1 + $0x360] sm:$0xff] }
  0x1a   :  { %226 = vmatpush.msra.mxu3 %v75_v46  ;;  %207 = vmatpush.msra.mxu2 %v58_v48  ;;  %v148_v11 = vld [vmem:[%s816_s1 + $0x3e8] sm:$0xff]  ;;  %v99_v12 = vld [vmem:[%s816_s1 + $0x260] sm:$0xff]  ;;  %v130_v14 = vld [vmem:[%s816_s1 + $0x358] sm:$0xff] }
  0x1b   :  { %186 = vmatpush.msra.mxu1 %v43_v47  ;;  %167 = vmatpush.msra.mxu0 %v26_v49  ;;  %v116_v13 = vld [vmem:[%s816_s1 + $0x2e8] sm:$0xff]  ;;  %v147_v15 = vld [vmem:[%s816_s1 + $0x3e0] sm:$0xff]  ;;  %v98_v16 = vld [vmem:[%s816_s1 + $0x258] sm:$0xff] }
  0x1c   :  { %227 = vmatpush.msra.mxu3 %v74_v50  ;;  %208 = vmatpush.msra.mxu2 %v57_v52  ;;  %v115_v17 = vld [vmem:[%s816_s1 + $0x2e0] sm:$0xff]  ;;  %v129_v18 = vld [vmem:[%s816_s1 + $0x350] sm:$0xff]  ;;  %v146_v19 = vld [vmem:[%s816_s1 + $0x3d8] sm:$0xff] }
  0x1d   :  { %187 = vmatpush.msra.mxu1 %v42_v51  ;;  %168 = vmatpush.msra.mxu0 %v25_v53  ;;  %v97_v20 = vld [vmem:[%s816_s1 + $0x250] sm:$0xff]  ;;  %v114_v21 = vld [vmem:[%s816_s1 + $0x2d8] sm:$0xff]  ;;  %v128_v22 = vld [vmem:[%s816_s1 + $0x348] sm:$0xff] }
  0x1e   :  { %228 = vmatpush.msra.mxu3 %v73_v54  ;;  %209 = vmatpush.msra.mxu2 %v56_v56  ;;  %v145_v23 = vld [vmem:[%s816_s1 + $0x3d0] sm:$0xff]  ;;  %v96_v24 = vld [vmem:[%s816_s1 + $0x248] sm:$0xff]  ;;  %v127_v26 = vld [vmem:[%s816_s1 + $0x340] sm:$0xff] }
  0x1f   :  { %188 = vmatpush.msra.mxu1 %v41_v55  ;;  %169 = vmatpush.msra.mxu0 %v24_v57  ;;  %v113_v25 = vld [vmem:[%s816_s1 + $0x2d0] sm:$0xff]  ;;  %v144_v27 = vld [vmem:[%s816_s1 + $0x3c8] sm:$0xff]  ;;  %v95_v28 = vld [vmem:[%s816_s1 + $0x240] sm:$0xff] }
  0x20   :  { %229 = vmatpush.msra.mxu3 %v72_v58  ;;  %210 = vmatpush.msra.mxu2 %v55_v60  ;;  %v112_v29 = vld [vmem:[%s816_s1 + $0x2c8] sm:$0xff]  ;;  %v126_v30 = vld [vmem:[%s816_s1 + $0x338] sm:$0xff]  ;;  %v143_v31 = vld [vmem:[%s816_s1 + $0x3c0] sm:$0xff] }
  0x21   :  { %189 = vmatpush.msra.mxu1 %v40_v59  ;;  %170 = vmatpush.msra.mxu0 %v23_v61  ;;  %v94_v32 = vld [vmem:[%s816_s1 + $0x238] sm:$0xff]  ;;  %v111_v33 = vld [vmem:[%s816_s1 + $0x2c0] sm:$0xff] }
  0x22   :  { %275 = vmatpush.msrb.mxu2 %v134_v62  ;;  %230 = vmatpush.msra.mxu3 %v71_v63 }
  0x23   :  { %235 = vmatpush.msrb.mxu0 %v102_v0  ;;  %190 = vmatpush.msra.mxu1 %v39_v3 }
  0x24   :  { %295 = vmatpush.msrb.mxu3 %v150_v1  ;;  %276 = vmatpush.msrb.mxu2 %v133_v2 }
  0x25   :  { %236 = vmatpush.msrb.mxu0 %v101_v4  ;;  %255 = vmatpush.msrb.mxu1 %v118_v5 }
  0x26   :  { %277 = vmatpush.msrb.mxu2 %v132_v6  ;;  %296 = vmatpush.msrb.mxu3 %v149_v7 }
  0x27   :  { %237 = vmatpush.msrb.mxu0 %v100_v8  ;;  %256 = vmatpush.msrb.mxu1 %v117_v9 }
  0x28   :  { %278 = vmatpush.msrb.mxu2 %v131_v10  ;;  %297 = vmatpush.msrb.mxu3 %v148_v11 }
  0x29   :  { %238 = vmatpush.msrb.mxu0 %v99_v12  ;;  %257 = vmatpush.msrb.mxu1 %v116_v13 }
  0x2a   :  { %279 = vmatpush.msrb.mxu2 %v130_v14  ;;  %298 = vmatpush.msrb.mxu3 %v147_v15 }
  0x2b   :  { %239 = vmatpush.msrb.mxu0 %v98_v16  ;;  %258 = vmatpush.msrb.mxu1 %v115_v17 }
  0x2c   :  { %280 = vmatpush.msrb.mxu2 %v129_v18  ;;  %299 = vmatpush.msrb.mxu3 %v146_v19 }
  0x2d   :  { %240 = vmatpush.msrb.mxu0 %v97_v20  ;;  %259 = vmatpush.msrb.mxu1 %v114_v21 }
  0x2e   :  { %281 = vmatpush.msrb.mxu2 %v128_v22  ;;  %300 = vmatpush.msrb.mxu3 %v145_v23 }
  0x2f   :  { %241 = vmatpush.msrb.mxu0 %v96_v24  ;;  %260 = vmatpush.msrb.mxu1 %v113_v25 }
  0x30   :  { %282 = vmatpush.msrb.mxu2 %v127_v26  ;;  %301 = vmatpush.msrb.mxu3 %v144_v27 }
  0x31   :  { %8 = vsyncpa [#allocation3], 0  ;;  %242 = vmatpush.msrb.mxu0 %v95_v28  ;;  %261 = vmatpush.msrb.mxu1 %v112_v29  ;;  %v125_v34 = vld [vmem:[%s816_s1 + $0x330] sm:$0xff]  ;;  %v142_v35 = vld [vmem:[%s816_s1 + $0x3b8] sm:$0xff]  ;;  %vm315_vm0 = vcmask 80896   ;;  %s336_s17 = sshll.u32 %s818_s3, 4  ;;  %s337_s17 = int_to_ptr.hbm [resolvable:$true] %s336_s17 }
  0x32   :  { %283 = vmatpush.msrb.mxu2 %v126_v30  ;;  %302 = vmatpush.msrb.mxu3 %v143_v31  ;;  %v93_v36 = vld [vmem:[%s816_s1 + $0x230] sm:$0xff]  ;;  %v110_v37 = vld [vmem:[%s816_s1 + $0x2b8] sm:$0xff]  ;;  %v124_v38 = vld [vmem:[%s816_s1 + $0x328] sm:$0xff] }
  0x33   :  { %243 = vmatpush.msrb.mxu0 %v94_v32  ;;  %262 = vmatpush.msrb.mxu1 %v111_v33  ;;  %v141_v39 = vld [vmem:[%s816_s1 + $0x3b0] sm:$0xff]  ;;  %v92_v40 = vld [vmem:[%s816_s1 + $0x228] sm:$0xff]  ;;  %v123_v42 = vld [vmem:[%s816_s1 + $0x320] sm:$0xff] }
  0x34   :  { %284 = vmatpush.msrb.mxu2 %v125_v34  ;;  %303 = vmatpush.msrb.mxu3 %v142_v35  ;;  %v109_v41 = vld [vmem:[%s816_s1 + $0x2b0] sm:$0xff]  ;;  %v140_v43 = vld [vmem:[%s816_s1 + $0x3a8] sm:$0xff]  ;;  %v91_v45 = vld [vmem:[%s816_s1 + $0x220] sm:$0xff] }
  0x35   :  { %244 = vmatpush.msrb.mxu0 %v93_v36  ;;  %263 = vmatpush.msrb.mxu1 %v110_v37  ;;  %v17_v44 = vld [vmem:[%s815_s0 + $0x10] sm:$0xff]  ;;  %v108_v46 = vld [vmem:[%s816_s1 + $0x2a8] sm:$0xff]  ;;  %v122_v47 = vld [vmem:[%s816_s1 + $0x318] sm:$0xff] }
  0x36   :  { %285 = vmatpush.msrb.mxu2 %v124_v38  ;;  %304 = vmatpush.msrb.mxu3 %v141_v39  ;;  %v139_v48 = vld [vmem:[%s816_s1 + $0x3a0] sm:$0xff]  ;;  %v18_v50 = vld [vmem:[%s815_s0 + $0x18] sm:$0xff]  ;;  %v121_v53 = vld [vmem:[%s816_s1 + $0x310] sm:$0xff] }
  0x37   :  { %245 = vmatpush.msrb.mxu0 %v92_v40  ;;  %264 = vmatpush.msrb.mxu1 %v109_v41  ;;  %v15_v49 = vld [vmem:[%s815_s0] sm:$0xff]  ;;  %v90_v51 = vld [vmem:[%s816_s1 + $0x218] sm:$0xff]  ;;  %v16_v55 = vld [vmem:[%s815_s0 + $0x8] sm:$0xff] }
  0x38   :  { %286 = vmatpush.msrb.mxu2 %v123_v42  ;;  %305 = vmatpush.msrb.mxu3 %v140_v43  ;;  %v107_v52 = vld [vmem:[%s816_s1 + $0x2a0] sm:$0xff]  ;;  %v138_v54 = vld [vmem:[%s816_s1 + $0x398] sm:$0xff]  ;;  %v89_v56 = vld [vmem:[%s816_s1 + $0x210] sm:$0xff] }
  0x39   :  { %211 = vmatmul.f32.vlgmr.msra.gmra.mxu2 %v17_v44  ;;  %246 = vmatpush.msrb.mxu0 %v91_v45  ;;  %v106_v57 = vld [vmem:[%s816_s1 + $0x298] sm:$0xff]  ;;  %v120_v58 = vld [vmem:[%s816_s1 + $0x308] sm:$0xff]  ;;  %v137_v59 = vld [vmem:[%s816_s1 + $0x390] sm:$0xff] }
  0x3a   :  { %265 = vmatpush.msrb.mxu1 %v108_v46  ;;  %287 = vmatpush.msrb.mxu2 %v122_v47  ;;  %v88_v60 = vld [vmem:[%s816_s1 + $0x208] sm:$0xff]  ;;  %v105_v61 = vld [vmem:[%s816_s1 + $0x290] sm:$0xff]  ;;  %v119_v62 = vld [vmem:[%s816_s1 + $0x300] sm:$0xff] }
  0x3b   :  { %306 = vmatpush.msrb.mxu3 %v139_v48  ;;  %171 = vmatmul.f32.vlgmr.msra.gmra.mxu0 %v15_v49  ;;  %v136_v63 = vld [vmem:[%s816_s1 + $0x388] sm:$0xff]  ;;  %v21_v0 = vld [vmem:[%s815_s0 + $0x30] sm:$0xff]  ;;  %v87_v1 = vld [vmem:[%s816_s1 + $0x200] sm:$0xff] }
  0x3c   :  { %231 = vmatmul.f32.vlgmr.msra.gmra.mxu3 %v18_v50  ;;  %247 = vmatpush.msrb.mxu0 %v90_v51  ;;  %v104_v2 = vld [vmem:[%s816_s1 + $0x288] sm:$0xff]  ;;  %v135_v3 = vld [vmem:[%s816_s1 + $0x380] sm:$0xff]  ;;  %v22_v5 = vld [vmem:[%s815_s0 + $0x38] sm:$0xff] }
  0x3d   :  { %266 = vmatpush.msrb.mxu1 %v107_v52  ;;  %288 = vmatpush.msrb.mxu2 %v121_v53  ;;  %v19_v4 = vld [vmem:[%s815_s0 + $0x20] sm:$0xff]  ;;  %v20_v7 = vld [vmem:[%s815_s0 + $0x28] sm:$0xff]  ;;  %s377_s0 = smov [#allocation2]  }
  0x3e   :  { %307 = vmatpush.msrb.mxu3 %v138_v54  ;;  %191 = vmatmul.f32.vlgmr.msra.gmra.mxu1 %v16_v55  ;;  %v103_v6 = vld [vmem:[%s816_s1 + $0x280] sm:$0xff]  ;;  %s334_s1 = sshll.u32 %s377_s0, 4  ;;  %s335_s1 = int_to_ptr.vmem [resolvable:$true] %s334_s1 }
  0x3f   :  { %248 = vmatpush.msrb.mxu0 %v89_v56  ;;  %267 = vmatpush.msrb.mxu1 %v106_v57  ;;  %v346_v8 = vld [vmem:[%s817_s2] ss:$0 sm:$0xff] }
  0x40   :  { %289 = vmatpush.msrb.mxu2 %v120_v58  ;;  %308 = vmatpush.msrb.mxu3 %v137_v59 }
  0x41   :  { %249 = vmatpush.msrb.mxu0 %v88_v60  ;;  %268 = vmatpush.msrb.mxu1 %v105_v61 }
  0x42   :  { %290 = vmatpush.msrb.mxu2 %v119_v62  ;;  %309 = vmatpush.msrb.mxu3 %v136_v63 }
  0x43   :  { %291 = vmatmul.f32.vlgmr.msrb.gmra.mxu2 %v21_v0  ;;  %250 = vmatpush.msrb.mxu0 %v87_v1 }
  0x44   :  { %269 = vmatpush.msrb.mxu1 %v104_v2  ;;  %310 = vmatpush.msrb.mxu3 %v135_v3 }
  0x45   :  { %251 = vmatmul.f32.vlgmr.msrb.gmra.mxu0 %v19_v4  ;;  %311 = vmatmul.f32.vlgmr.msrb.gmra.mxu3 %v22_v5 }
  0x46   :  { %270 = vmatpush.msrb.mxu1 %v103_v6 }
  0x47   :  { %271 = vmatmul.f32.vlgmr.msrb.gmra.mxu1 %v20_v7 }
  0xb8   :  { %v172_v9 = vpop.f32.mrf.mxu0 }
  0xb9   :  { %v173_v10 = vadd.f32 %v346_v8, %v172_v9 }
  0xbb   :  { %v192_v11 = vpop.f32.mrf.mxu1 }
  0xbc   :  { %v193_v12 = vadd.f32 %v192_v11, %v173_v10  ;;  %v212_v13 = vpop.f32.mrf.mxu2 }
  0xbe   :  { %v213_v14 = vadd.f32 %v212_v13, %v193_v12 }
  0xbf   :  { %v232_v15 = vpop.f32.mrf.mxu3 }
  0xc0   :  { %v233_v16 = vadd.f32 %v232_v15, %v213_v14 }
  0xc2   :  { %v252_v17 = vpop.f32.mrf.mxu0 }
  0xc3   :  { %v253_v18 = vadd.f32 %v252_v17, %v233_v16 }
  0xc4   :  { %v272_v19 = vpop.f32.mrf.mxu1 }
  0xc5   :  { %v273_v20 = vadd.f32 %v272_v19, %v253_v18 }
  0xc6   :  { %v292_v21 = vpop.f32.mrf.mxu2 }
  0xc7   :  { %v293_v22 = vadd.f32 %v292_v21, %v273_v20 }
  0xc8   :  { %v312_v23 = vpop.f32.mrf.mxu3 }
  0xc9   :  { %v313_v24 = vadd.f32 %v312_v23, %v293_v22 }
  0xcb   :  { %v316_v25 = vsel %vm315_vm0, %v313_v24, -inf }
  0xcc   :  { %317 = vmax.xlane.f32.xlu0 %v316_v25 }
 0x13f   :  { %v318_v26 = vpop.xlane.xlu0 %317 }
 0x140   :  { %v319_v27 = vsub.f32 %v313_v24, %v318_v26 }
 0x142   :  { %v320_v28 = vmul.f32 1.442695, %v319_v27 }
 0x144   :  { %347 = vpow2.f32 %v320_v28 }
 0x14a   :  { %v348_v29 = vpop.eup %347 }
 0x14b   :  { %v322_v30 = vsel %vm315_vm0, %v348_v29, 0.0 }
 0x14c   :  { %323 = vadd.xlane.f32.xlu0 %v322_v30 }
 0x1bf   :  { %v324_v31 = vpop.xlane.xlu0 %323 }
 0x1c0   :  { %349 = vlog2.f32 %v324_v31 }
 0x1c6   :  { %v350_v32 = vpop.eup %349 }
 0x1c7   :  { %v326_v33 = vmul.f32 0.6931472, %v350_v32 }
 0x1c9   :  { %v327_v34 = vsub.f32 %v319_v27, %v326_v33 }
 0x1cb   :  { %328 = vst.msk [vmem:[#allocation2] sm:$0xff] %vm315_vm0, %v327_v34 }
 0x1cc   :  { %339 = dma.vmem_to_hbm [thread:$0]  %s335_s1, 128, %s337_s17, [#allocation3]  }
 0x1cd   :  { %375 = dma.done.wait [#allocation3], 128  }
 0x1ce   :  { %376 = vsyncadd [#allocation3], 4294967168 }
 0x1cf   :  { %344 = vsyncpa [#allocation3], 1 }

</bundles_post_ra>
